<compile_context>
chip_gen: v7x
topology: tpu7x:2x2x1
jax: 0.10.0
libtpu: 0.0.40
codegen_flags: <defaults>
</compile_context>

<pallas_src>
import functools

import jax
import jax.numpy as jnp
from jax.experimental import pallas as pl
from jax.experimental.pallas import tpu as pltpu


def _round_up(x, m):
    return (x + m - 1) // m * m


def _vmem_limit_bytes():
    """Per-core VMEM budget: capacity - 16 MiB headroom, capped at 100 MiB."""
    cap = 64 * 1024 * 1024                      # conservative fallback (v7x per-TC VMEM)
    try:
        info = pltpu.get_tpu_info()
        cap = int(getattr(info, "vmem_capacity_bytes", cap) or cap)
    except Exception:
        pass
    return max(32 * 1024 * 1024, min(cap - 16 * 1024 * 1024, 100 * 1024 * 1024))


def _fcz_resident_kernel(n_res, alpha_ref, x_ref, wres_ref, bres_ref,
                         wout_ref, bout_ref, o_ref, h_ref):
    """grid = (batch_tiles, deep). Whole weight stack is VMEM-resident.

    alpha_ref : SMEM (n_res,)         f32       residual gate scalars
    x_ref     : VMEM (TB, Dp)         f32       input tile (constant along layer axis)
    wres_ref  : VMEM (n_res, Dp, Dp)  f32/bf16  resident residual weight stack
    bres_ref  : VMEM (n_res, 1, Dp)   f32       resident residual bias stack
    wout_ref  : VMEM (Dp, Dop)        f32/bf16  resident final weight
    bout_ref  : VMEM (1, Dop)         f32       resident final bias
    o_ref     : VMEM (TB, Dop)        f32       output tile (written at last step)
    h_ref     : VMEM (TB, Dp)         f32       persistent activation accumulator
    """
    l = pl.program_id(1)
    last = pl.num_programs(1) - 1
    li = jnp.minimum(l, n_res - 1)              # clamp: hardens reads at the final step

    @pl.when(l == 0)
    def _():
        h_ref[...] = x_ref[...]

    @pl.when(l < n_res)
    def _():
        h = h_ref[...]
        w = wres_ref[li]                                     # (Dp, Dp)
        z = jnp.dot(h.astype(w.dtype), w,
                    preferred_element_type=jnp.float32)
        z = z + bres_ref[li]                                 # (1, Dp) broadcast, f32
        h_ref[...] = h + alpha_ref[li] * jnp.maximum(z, 0.0)

    @pl.when(l == last)
    def _():
        h = h_ref[...]
        w = wout_ref[...]
        out = jnp.dot(h.astype(w.dtype), w, preferred_element_type=jnp.float32)
        o_ref[...] = (out + bout_ref[...]).astype(o_ref.dtype)


def _fcz_stream_kernel(n_res, nk, tk, alpha_ref, x_ref, wres_ref, bres_ref,
                       wout_ref, bout_ref, o_ref, h_ref, z_ref):
    """grid = (batch_tiles, deep, nk). Weights streamed as (tk, .) contraction slabs.

    h is kept K-split as (nk, TB, tk) so per-step reads are leading-axis dynamic
    indexing (h_ref[k]) instead of dynamic lane-dim slices; z_ref is the f32
    pre-activation accumulator for the current layer.
    """
    l = pl.program_id(1)
    k = pl.program_id(2)
    last = pl.num_programs(1) - 1
    li = jnp.minimum(l, n_res - 1)

    @pl.when((l == 0) & (k == 0))
    def _():
        for j in range(nk):                                  # static unroll
            h_ref[j] = x_ref[:, j * tk:(j + 1) * tk]

    @pl.when(l < n_res)
    def _():
        w = wres_ref[0]                                      # (tk, Dp)
        part = jnp.dot(h_ref[k].astype(w.dtype), w,
                       preferred_element_type=jnp.float32)   # (TB, Dp)

        @pl.when(k == 0)
        def _():
            z_ref[...] = part

        @pl.when(k != 0)
        def _():
            z_ref[...] = z_ref[...] + part

        @pl.when(k == nk - 1)
        def _():
            a = jnp.maximum(z_ref[...] + bres_ref[li], 0.0)
            alpha = alpha_ref[li]
            for j in range(nk):                              # static unroll
                h_ref[j] = h_ref[j] + alpha * a[:, j * tk:(j + 1) * tk]

    @pl.when(l == last)
    def _():
        w = wout_ref[...]                                    # (tk, Dop)
        part = jnp.dot(h_ref[k].astype(w.dtype), w,
                       preferred_element_type=jnp.float32)   # (TB, Dop)

        @pl.when(k == 0)
        def _():
            o_ref[...] = part

        @pl.when(k != 0)
        def _():
            o_ref[...] = o_ref[...] + part

        @pl.when(k == nk - 1)
        def _():
            o_ref[...] = o_ref[...] + bout_ref[...]


def _linear_kernel(x_ref, w_ref, b_ref, o_ref):
    """deep == 1 path: plain tiled linear, grid = (batch_tiles,)."""
    w = w_ref[...]
    out = jnp.dot(x_ref[...].astype(w.dtype), w, preferred_element_type=jnp.float32)
    o_ref[...] = (out + b_ref[...]).astype(o_ref.dtype)


def fczerolin_forward(x, w_res, b_res, alphas, w_out, b_out, *,
                      batch_tile=None, use_bf16=True, weight_residency=None,
                      k_tile=None):
    """FcZeroLin forward.

    x: (B, D_in) f32.  w_res: (deep-1, D_in, D_in), pre-transposed so layer l is
    h @ w_res[l].  b_res: (deep-1, D_in).  alphas: (deep-1,).  w_out: (D_in, D_out),
    pre-transposed.  b_out: (D_out,).  Returns (B, D_out) f32.

    weight_residency: None = auto (fit-based), True/False forces resident/streaming.
    k_tile: force the streaming contraction tile (multiple of 128 dividing D_in_p).
    """
    B, d_in = x.shape
    d_out = w_out.shape[1]
    n_res = int(w_res.shape[0])                 # deep - 1
    deep = n_res + 1

    d_in_p = _round_up(d_in, 128)               # MXU / lane alignment
    d_out_p = _round_up(d_out, 128)             # lane-dense output stores
    b8 = _round_up(B, 8)

    w_dtype = jnp.bfloat16 if use_bf16 else jnp.float32
    w_bytes = jnp.dtype(w_dtype).itemsize
    vmem_limit = _vmem_limit_bytes()

    w_out_p = jnp.zeros((d_in_p, d_out_p), w_dtype).at[:d_in, :d_out].set(
        w_out.astype(w_dtype))
    b_out_p = jnp.zeros((1, d_out_p), jnp.float32).at[0, :d_out].set(b_out.reshape(-1))

    # -------- deep == 1: plain linear head, no dummy residual slabs at all --------
    if n_res == 0:
        tb = (max(8, _round_up(int(batch_tile), 8)) if batch_tile is not None
              else min(256, b8))
        if batch_tile is None and b8 >= 256 and b8 < 2 * tb:
            tb = _round_up(-(-b8 // 2), 8)       # >= 2 tiles so both v7x TCs get work
        b_p = _round_up(b8, tb)
        x_p = jnp.zeros((b_p, d_in_p), jnp.float32).at[:B, :d_in].set(x)
        out_p = pl.pallas_call(
            _linear_kernel,
            out_shape=jax.ShapeDtypeStruct((b_p, d_out_p), jnp.float32),
            grid=(b_p // tb,),
            in_specs=[
                pl.BlockSpec((tb, d_in_p), lambda b: (b, 0)),
                pl.BlockSpec((d_in_p, d_out_p), lambda b: (0, 0),
                             pipeline_mode=pl.Buffered(1)),       # resident W_out
                pl.BlockSpec((1, d_out_p), lambda b: (0, 0),
                             pipeline_mode=pl.Buffered(1)),       # resident b_out
            ],
            out_specs=pl.BlockSpec((tb, d_out_p), lambda b: (b, 0)),
            compiler_params=pltpu.CompilerParams(
                dimension_semantics=("parallel",), vmem_limit_bytes=vmem_limit),
        )(x_p, w_out_p, b_out_p)
        return out_p[:B, :d_out]

    # -------- mode selection: resident weight stack vs K-tiled streaming --------
    stack_bytes = (n_res * d_in_p * d_in_p + d_in_p * d_out_p) * w_bytes   # 1-buffered
    bias_bytes = n_res * d_in_p * 4 + d_out_p * 4
    if weight_residency is None:
        # keep >= ~35% of the VMEM budget for x / h / output tiles
        resident = stack_bytes + bias_bytes <= 0.65 * vmem_limit
    else:
        resident = bool(weight_residency)

    if resident:
        tk, nk = d_in_p, 1
        weights_vmem = stack_bytes + bias_bytes
    else:
        if k_tile is not None:
            tk = int(k_tile)
            assert tk % 128 == 0 and d_in_p % tk == 0, (tk, d_in_p)
        else:
            # largest tk (multiple of 128 dividing D_in_p) whose double-buffered
            # weight slabs use <= ~40% of the VMEM budget
            tk = 128
            for nk_cand in range(1, d_in_p // 128 + 1):
                if d_in_p % (nk_cand * 128):
                    continue
                cand = d_in_p // nk_cand
                if 2 * cand * (d_in_p + d_out_p) * w_bytes <= 0.4 * vmem_limit:
                    tk = cand
                    break
        nk = d_in_p // tk
        weights_vmem = ((2 * tk * d_in_p + (2 if nk > 1 else 1) * tk * d_out_p) * w_bytes
                        + bias_bytes)

    def _act_vmem(tb_):
        # x (2 bufs) + h + [z, streaming only] + out (2 bufs), all f32
        per_row = 3 * d_in_p + (0 if resident else d_in_p) + 2 * d_out_p
        return 4 * tb_ * per_row

    # -------- batch tile: roofline-sized, >= 2 tiles for megacore, VMEM-fitted ------
    if batch_tile is not None:
        tb = max(8, _round_up(int(batch_tile), 8))
    else:
        # streaming regime: the per-layer weight DMA is only hidden behind the MXU
        # when tb >~ 650 (v6e) / 310 (v7x) / 240 (v5e); residency amortizes it.
        tb = 512 if not resident else 256
        tb = min(tb, b8)
        if b8 >= 256 and b8 < 2 * tb:
            tb = _round_up(-(-b8 // 2), 8)       # split batch across both v7x TCs
        while tb > 8 and weights_vmem + _act_vmem(tb) > 0.9 * vmem_limit:
            tb = max(8, _round_up(tb // 2, 8))
    b_p = _round_up(b8, tb)

    # -------- pad / lay out operands (zeros keep the math exact) --------
    x_p = jnp.zeros((b_p, d_in_p), jnp.float32).at[:B, :d_in].set(x)
    w_res_p = jnp.zeros((n_res, d_in_p, d_in_p), w_dtype).at[:, :d_in, :d_in].set(
        w_res.astype(w_dtype))
    b_res_p = jnp.zeros((n_res, 1, d_in_p), jnp.float32).at[:, 0, :d_in].set(b_res)
    alphas_p = jnp.asarray(alphas, jnp.float32).reshape(n_res)

    if resident:
        grid = (b_p // tb, deep)
        kernel = functools.partial(_fcz_resident_kernel, n_res)
        in_specs = [
            pl.BlockSpec(memory_space=pltpu.MemorySpace.SMEM),             # alphas
            pl.BlockSpec((tb, d_in_p), lambda b, l: (b, 0)),               # x tile
            pl.BlockSpec((n_res, d_in_p, d_in_p), lambda b, l: (0, 0, 0),
                         pipeline_mode=pl.Buffered(1)),                    # resident W stack
            pl.BlockSpec((n_res, 1, d_in_p), lambda b, l: (0, 0, 0),
                         pipeline_mode=pl.Buffered(1)),                    # resident biases
            pl.BlockSpec((d_in_p, d_out_p), lambda b, l: (0, 0),
                         pipeline_mode=pl.Buffered(1)),                    # resident W_out
            pl.BlockSpec((1, d_out_p), lambda b, l: (0, 0),
                         pipeline_mode=pl.Buffered(1)),                    # resident b_out
        ]
        out_spec = pl.BlockSpec((tb, d_out_p), lambda b, l: (b, 0))
        scratch = [pltpu.VMEM((tb, d_in_p), jnp.float32)]                  # h accumulator
        semantics = ("parallel", "arbitrary")
    else:
        grid = (b_p // tb, deep, nk)
        kernel = functools.partial(_fcz_stream_kernel, n_res, nk, tk)

        def wres_idx(b, l, k):
            # clamp at the final (linear) step so at most one extra K-slab is refetched
            return (jnp.minimum(l, n_res - 1), jnp.where(l < n_res, k, 0), 0)

        def wout_idx(b, l, k):
            # keep the W_out slab parked at block 0 during the residual layers
            return (jnp.where(l < n_res, 0, k), 0)

        wout_spec = (pl.BlockSpec((tk, d_out_p), wout_idx, pipeline_mode=pl.Buffered(1))
                     if nk == 1 else pl.BlockSpec((tk, d_out_p), wout_idx))
        in_specs = [
            pl.BlockSpec(memory_space=pltpu.MemorySpace.SMEM),             # alphas
            pl.BlockSpec((tb, d_in_p), lambda b, l, k: (b, 0)),            # x tile
            pl.BlockSpec((1, tk, d_in_p), wres_idx),                       # streamed W_l slab
            pl.BlockSpec((n_res, 1, d_in_p), lambda b, l, k: (0, 0, 0),
                         pipeline_mode=pl.Buffered(1)),                    # resident biases
            wout_spec,                                                     # W_out K-slab
            pl.BlockSpec((1, d_out_p), lambda b, l, k: (0, 0),
                         pipeline_mode=pl.Buffered(1)),                    # resident b_out
        ]
        out_spec = pl.BlockSpec((tb, d_out_p), lambda b, l, k: (b, 0))
        scratch = [pltpu.VMEM((nk, tb, tk), jnp.float32),                  # h (K-split)
                   pltpu.VMEM((tb, d_in_p), jnp.float32)]                  # z accumulator
        semantics = ("parallel", "arbitrary", "arbitrary")

    out_p = pl.pallas_call(
        kernel,
        out_shape=jax.ShapeDtypeStruct((b_p, d_out_p), jnp.float32),
        grid=grid,
        in_specs=in_specs,
        out_specs=out_spec,
        scratch_shapes=scratch,
        compiler_params=pltpu.CompilerParams(
            dimension_semantics=semantics, vmem_limit_bytes=vmem_limit),
    )(alphas_p, x_p, w_res_p, b_res_p, w_out_p, b_out_p)

    return out_p[:B, :d_out]


def init_params(key, in_dim, out_dim, deep):
    """PyTorch-style nn.Linear init (uniform +-1/sqrt(fan_in)); weights pre-transposed."""
    n_res = deep - 1
    keys = jax.random.split(key, 2 * deep)
    bound = 1.0 / (in_dim ** 0.5)

    w_res, b_res = [], []
    for l in range(n_res):
        w = jax.random.uniform(keys[2 * l], (in_dim, in_dim), jnp.float32, -bound, bound)
        b = jax.random.uniform(keys[2 * l + 1], (in_dim,), jnp.float32, -bound, bound)
        w_res.append(w.T)                               # pre-transpose for h @ W
        b_res.append(b)
    if n_res > 0:
        w_res = jnp.stack(w_res)
        b_res = jnp.stack(b_res)
    else:
        w_res = jnp.zeros((0, in_dim, in_dim), jnp.float32)
        b_res = jnp.zeros((0, in_dim), jnp.float32)

    w_last = jax.random.uniform(keys[-2], (out_dim, in_dim), jnp.float32, -bound, bound)
    b_last = jax.random.uniform(keys[-1], (out_dim,), jnp.float32, -bound, bound)

    # l_alphas are nn.Parameter(torch.Tensor([0.0])) -> all zeros at init.
    alphas = jnp.zeros((n_res,), jnp.float32)
    return w_res, b_res, alphas, w_last.T, b_last


def reference_forward(h, w_res, b_res, alphas, w_out, b_out):
    """Pure-JAX f32 reference matching the PyTorch module (ReLU activation)."""
    for l in range(w_res.shape[0]):
        z = h @ w_res[l] + b_res[l][None, :]
        h = h + alphas[l] * jnp.maximum(z, 0.0)
    return h @ w_out + b_out[None, :]


if __name__ == "__main__":
    def check(out, ref, tol):
        assert out.shape == ref.shape, (out.shape, ref.shape)
        num = float(jnp.linalg.norm(out.astype(jnp.float32) - ref))
        den = float(jnp.linalg.norm(ref)) + 1e-30
        assert num / den < tol, (num / den, tol)

    # --- case 1: small dims, residual path, auto (resident-weight) mode ---
    B, IN_DIM, OUT_DIM, DEEP = 6, 32, 16, 3
    k_x, k_p, k_a = jax.random.split(jax.random.PRNGKey(0), 3)
    x = jax.random.normal(k_x, (B, IN_DIM), jnp.float32)
    w_res, b_res, alphas0, w_out, b_out = init_params(k_p, IN_DIM, OUT_DIM, DEEP)
    alphas_nz = jax.random.uniform(k_a, (DEEP - 1,), jnp.float32, -0.5, 0.5)
    for alphas in (alphas0, alphas_nz):        # module default (zeros) + nonzero gates
        ref = reference_forward(x, w_res, b_res, alphas, w_out, b_out)
        out = jax.block_until_ready(fczerolin_forward(
            x, w_res, b_res, alphas, w_out, b_out, use_bf16=False))
        check(out, ref, 5e-3)
        out = jax.block_until_ready(fczerolin_forward(
            x, w_res, b_res, alphas, w_out, b_out, use_bf16=True))
        check(out, ref, 5e-2)

    # --- case 2: forced streaming / K-tiled path with several batch tiles ---
    B, IN_DIM, OUT_DIM, DEEP = 40, 256, 48, 3
    k_x, k_p, k_a = jax.random.split(jax.random.PRNGKey(1), 3)
    x = jax.random.normal(k_x, (B, IN_DIM), jnp.float32)
    w_res, b_res, _, w_out, b_out = init_params(k_p, IN_DIM, OUT_DIM, DEEP)
    alphas = jax.random.uniform(k_a, (DEEP - 1,), jnp.float32, -0.5, 0.5)
    ref = reference_forward(x, w_res, b_res, alphas, w_out, b_out)
    out = jax.block_until_ready(fczerolin_forward(
        x, w_res, b_res, alphas, w_out, b_out,
        use_bf16=False, weight_residency=False, k_tile=128, batch_tile=16))
    check(out, ref, 5e-3)
    out = jax.block_until_ready(fczerolin_forward(
        x, w_res, b_res, alphas, w_out, b_out,
        use_bf16=True, weight_residency=False, k_tile=128, batch_tile=16))
    check(out, ref, 5e-2)

    # --- case 3: deep == 1 (pure linear head, no residual layers) ---
    B, IN_DIM, OUT_DIM, DEEP = 6, 32, 16, 1
    k_x, k_p = jax.random.split(jax.random.PRNGKey(2), 2)
    x = jax.random.normal(k_x, (B, IN_DIM), jnp.float32)
    w_res, b_res, alphas, w_out, b_out = init_params(k_p, IN_DIM, OUT_DIM, DEEP)
    ref = reference_forward(x, w_res, b_res, alphas, w_out, b_out)
    out = jax.block_until_ready(fczerolin_forward(
        x, w_res, b_res, alphas, w_out, b_out, use_bf16=False))
    check(out, ref, 5e-3)

    print("KERNEL_OK")
</pallas_src>

<mosaic_0001>
module attributes {stable_mosaic.version = 11 : i64} {
  func.func @_fcz_resident_kernel(%arg0: i32, %arg1: i32, %arg2: memref<2xf32, #tpu.memory_space<smem>>, %arg3: memref<8x128xf32, #tpu.memory_space<vmem>>, %arg4: memref<2x128x128xf32, #tpu.memory_space<vmem>>, %arg5: memref<2x1x128xf32, #tpu.memory_space<vmem>>, %arg6: memref<128x128xf32, #tpu.memory_space<vmem>>, %arg7: memref<1x128xf32, #tpu.memory_space<vmem>>, %arg8: memref<8x128xf32, #tpu.memory_space<vmem>>, %arg9: memref<8x128xf32, #tpu.memory_space<vmem>>) attributes {dimension_semantics = [#tpu.dimension_semantics<parallel>, #tpu.dimension_semantics<arbitrary>], iteration_bounds = array<i64: 1, 3>, scalar_prefetch = 0 : i64, scratch_operands = 1 : i64, tpu.core_type = #tpu.core_type<tc>, window_params = [{transform_indices = @transform_0, window_bounds = array<i64: 2>}, {transform_indices = @transform_1, window_bounds = array<i64: 8, 128>}, {pipeline_mode = #tpu.pipeline_mode<synchronous>, transform_indices = @transform_2, window_bounds = array<i64: 2, 128, 128>}, {pipeline_mode = #tpu.pipeline_mode<synchronous>, transform_indices = @transform_3, window_bounds = array<i64: 2, 1, 128>}, {pipeline_mode = #tpu.pipeline_mode<synchronous>, transform_indices = @transform_4, window_bounds = array<i64: 128, 128>}, {pipeline_mode = #tpu.pipeline_mode<synchronous>, transform_indices = @transform_5, window_bounds = array<i64: 1, 128>}, {transform_indices = @transform_6, window_bounds = array<i64: 8, 128>}]} {
    %c1_i32 = arith.constant 1 : i32
    %0 = arith.minsi %arg1, %c1_i32 : i32
    %c0_i32 = arith.constant 0 : i32
    %1 = arith.cmpi eq, %arg1, %c0_i32 : i32
    %2 = arith.extui %1 : i1 to i32
    %c0_i32_0 = arith.constant 0 : i32
    %3 = arith.cmpi ne, %2, %c0_i32_0 : i32
    scf.if %3 {
      %c0 = arith.constant 0 : index
      %c0_4 = arith.constant 0 : index
      %10 = vector.load %arg3[%c0, %c0_4] : memref<8x128xf32, #tpu.memory_space<vmem>>, vector<8x128xf32>
      %c0_5 = arith.constant 0 : index
      %c0_6 = arith.constant 0 : index
      %11 = vector.load %arg9[%c0_5, %c0_6] : memref<8x128xf32, #tpu.memory_space<vmem>>, vector<8x128xf32>
      tpu.vector_store %arg9[%c0_5, %c0_6], %10 {strides = array<i32>} : memref<8x128xf32, #tpu.memory_space<vmem>>, vector<8x128xf32>,
    } else {
    }
    %c2_i32 = arith.constant 2 : i32
    %4 = arith.cmpi slt, %arg1, %c2_i32 : i32
    %5 = arith.extui %4 : i1 to i32
    %c0_i32_1 = arith.constant 0 : i32
    %6 = arith.cmpi ne, %5, %c0_i32_1 : i32
    scf.if %6 {
      %c0 = arith.constant 0 : index
      %c0_4 = arith.constant 0 : index
      %10 = vector.load %arg9[%c0, %c0_4] : memref<8x128xf32, #tpu.memory_space<vmem>>, vector<8x128xf32>
      %11 = arith.index_cast %0 : i32 to index
      %c0_5 = arith.constant 0 : index
      %c0_6 = arith.constant 0 : index
      %12 = vector.load %arg4[%11, %c0_5, %c0_6] : memref<2x128x128xf32, #tpu.memory_space<vmem>>, vector<1x128x128xf32>
      %13 = vector.shape_cast %12 : vector<1x128x128xf32> to vector<128x128xf32>
      %cst = arith.constant dense<0.000000e+00> : vector<8x128xf32>
      %14 = tpu.matmul %10, %13, %cst {dimension_numbers = #tpu.dot_dimension_numbers<[1], [0], [0], [1], [0, 0, 1, 1], [], []>} : vector<8x128xf32>, vector<128x128xf32>, vector<8x128xf32> -> vector<8x128xf32>
      %15 = arith.index_cast %0 : i32 to index
      %c0_7 = arith.constant 0 : index
      %c0_8 = arith.constant 0 : index
      %16 = vector.load %arg5[%15, %c0_7, %c0_8] : memref<2x1x128xf32, #tpu.memory_space<vmem>>, vector<1x1x128xf32>
      %17 = vector.shape_cast %16 : vector<1x1x128xf32> to vector<1x128xf32>
      %18 = vector.broadcast %17 : vector<1x128xf32> to vector<8x128xf32>
      %19 = arith.addf %14, %18 : vector<8x128xf32>
      %20 = arith.index_cast %0 : i32 to index
      %21 = memref.load %arg2[%20] : memref<2xf32, #tpu.memory_space<smem>>
      %cst_9 = arith.constant 0.000000e+00 : f32
      %22 = vector.broadcast %cst_9 : f32 to vector<8x128xf32>
      %23 = arith.maximumf %19, %22 : vector<8x128xf32>
      %24 = vector.broadcast %21 : f32 to vector<8x128xf32>
      %25 = arith.mulf %24, %23 : vector<8x128xf32>
      %26 = arith.addf %10, %25 : vector<8x128xf32>
      %c0_10 = arith.constant 0 : index
      %c0_11 = arith.constant 0 : index
      %27 = vector.load %arg9[%c0_10, %c0_11] : memref<8x128xf32, #tpu.memory_space<vmem>>, vector<8x128xf32>
      tpu.vector_store %arg9[%c0_10, %c0_11], %26 {strides = array<i32>} : memref<8x128xf32, #tpu.memory_space<vmem>>, vector<8x128xf32>,
    } else {
    }
    %c2_i32_2 = arith.constant 2 : i32
    %7 = arith.cmpi eq, %arg1, %c2_i32_2 : i32
    %8 = arith.extui %7 : i1 to i32
    %c0_i32_3 = arith.constant 0 : i32
    %9 = arith.cmpi ne, %8, %c0_i32_3 : i32
    scf.if %9 {
      %c0 = arith.constant 0 : index
      %c0_4 = arith.constant 0 : index
      %10 = vector.load %arg9[%c0, %c0_4] : memref<8x128xf32, #tpu.memory_space<vmem>>, vector<8x128xf32>
      %c0_5 = arith.constant 0 : index
      %c0_6 = arith.constant 0 : index
      %11 = vector.load %arg6[%c0_5, %c0_6] : memref<128x128xf32, #tpu.memory_space<vmem>>, vector<128x128xf32>
      %cst = arith.constant dense<0.000000e+00> : vector<8x128xf32>
      %12 = tpu.matmul %10, %11, %cst {dimension_numbers = #tpu.dot_dimension_numbers<[1], [0], [0], [1], [0, 0, 1, 1], [], []>} : vector<8x128xf32>, vector<128x128xf32>, vector<8x128xf32> -> vector<8x128xf32>
      %c0_7 = arith.constant 0 : index
      %c0_8 = arith.constant 0 : index
      %13 = vector.load %arg7[%c0_7, %c0_8] : memref<1x128xf32, #tpu.memory_space<vmem>>, vector<1x128xf32>
      %14 = vector.broadcast %13 : vector<1x128xf32> to vector<8x128xf32>
      %15 = arith.addf %12, %14 : vector<8x128xf32>
      %c0_9 = arith.constant 0 : index
      %c0_10 = arith.constant 0 : index
      %16 = vector.load %arg8[%c0_9, %c0_10] : memref<8x128xf32, #tpu.memory_space<vmem>>, vector<8x128xf32>
      tpu.vector_store %arg8[%c0_9, %c0_10], %15 {strides = array<i32>} : memref<8x128xf32, #tpu.memory_space<vmem>>, vector<8x128xf32>,
    } else {
    }
    return
  }
  func.func @transform_0(%arg0: i32, %arg1: i32) -> i32 {
    %c0_i32 = arith.constant 0 : i32
    %c0_i32_0 = arith.constant 0 : i32
    return %c0_i32 : i32
  }
  func.func @transform_1(%arg0: i32, %arg1: i32) -> (i32, i32) {
    %c0_i32 = arith.constant 0 : i32
    %c0_i32_0 = arith.constant 0 : i32
    return %arg0, %c0_i32 : i32, i32
  }
  func.func @transform_2(%arg0: i32, %arg1: i32) -> (i32, i32, i32) {
    %c0_i32 = arith.constant 0 : i32
    %c0_i32_0 = arith.constant 0 : i32
    %c0_i32_1 = arith.constant 0 : i32
    %c0_i32_2 = arith.constant 0 : i32
    return %c0_i32, %c0_i32_0, %c0_i32_1 : i32, i32, i32
  }
  func.func @transform_3(%arg0: i32, %arg1: i32) -> (i32, i32, i32) {
    %c0_i32 = arith.constant 0 : i32
    %c0_i32_0 = arith.constant 0 : i32
    %c0_i32_1 = arith.constant 0 : i32
    %c0_i32_2 = arith.constant 0 : i32
    return %c0_i32, %c0_i32_0, %c0_i32_1 : i32, i32, i32
  }
  func.func @transform_4(%arg0: i32, %arg1: i32) -> (i32, i32) {
    %c0_i32 = arith.constant 0 : i32
    %c0_i32_0 = arith.constant 0 : i32
    %c0_i32_1 = arith.constant 0 : i32
    return %c0_i32, %c0_i32_0 : i32, i32
  }
  func.func @transform_5(%arg0: i32, %arg1: i32) -> (i32, i32) {
    %c0_i32 = arith.constant 0 : i32
    %c0_i32_0 = arith.constant 0 : i32
    %c0_i32_1 = arith.constant 0 : i32
    return %c0_i32, %c0_i32_0 : i32, i32
  }
  func.func @transform_6(%arg0: i32, %arg1: i32) -> (i32, i32) {
    %c0_i32 = arith.constant 0 : i32
    %c0_i32_0 = arith.constant 0 : i32
    return %arg0, %c0_i32 : i32, i32
  }
}

</mosaic_0001>

<bundles_post_ra>
// kernel: tpu_custom_call.1
= control target key start
LH: loop header
LB: loop body
LE: loop exit
PB: predicated region body
PF: predicated region fallthrough
CT: control target
= control target key end

     0   :  { %11 = vsyncpa [#allocation6], 0  ;;  %s1281_s0 = inlined_call_operand.hbm [shape: f32[2], index: 0, kind: input, shape index: {}]   ;;  %s1282_s1 = inlined_call_operand.hbm [shape: f32[8,128], index: 1, kind: input, shape index: {}]   ;;  %s1283_s2 = inlined_call_operand.hbm [shape: f32[2,128,128], index: 2, kind: input, shape index: {}]   ;;  %s1284_s3 = inlined_call_operand.vmem [shape: f32[2,1,128], index: 3, kind: input, shape index: {}]   ;;  %s1285_s4 = inlined_call_operand.hbm [shape: f32[128,128], index: 4, kind: input, shape index: {}]   ;;  %s1286_s5 = inlined_call_operand.vmem [shape: f32[1,128], index: 5, kind: input, shape index: {}]   ;;  %s1287_s6 = inlined_call_operand.hbm [shape: f32[8,128], index: 6, kind: output, shape index: {}]  }
   0x1   :  { %12 = vsyncpa [#allocation4], 0 }
   0x2   :  { %13 = vsyncpa [#allocation9], 0 }
   0x3   :  { %14 = vsyncpa [#allocation5], 0  ;;  %s1069_s21 = smov 0   ;;  %s1071_s22 = smov 0  }
   0x4   :  { %s1073_s23 = smov 0  }
   0x5 LB: > { %s1021_s24 = smov [#allocation8]   ;;  %s605_s26 = sadd.s32 4294967295, %s1019_s23   ;;  %s1019_s23 = sphi %s1073_s23, %s20_s23   ;;  %s1015_s22 = sphi %s1071_s22, %s1301_s22   ;;  %s1011_s21 = sphi %s1069_s21, %s1300_s21  }
   0x6   : > { %s228_s25 = sshll.u32 %s1021_s24, 4  ;;  %p606_p0 = scmp.ge.s32.totalorder %s1019_s23, 1  ;;  %s229_s25 = int_to_ptr.vmem [resolvable:$true] %s228_s25 }
   0x7   : > { %p194_p1 = scmp.lt.s32.totalorder %s1019_s23, 4  ;;  %p1089_p2 = scmp.eq.s32.totalorder %s605_s26, 0 }
   0x8   : > { %s29_s30 = sadd.s32 1, %s1015_s22  ;;  %s858_s10 = scalar_lea.hbm %s1283_s2, 4096 }
   0x9   : > { %s1291_s27 = scalar_select %p1089_p2, 1, 0 }
   0xa   : > { %p1093_p3 = pnand %p606_p0, %p194_p1  ;;  %p1106_p6 = scmp.ge.s32.totalorder %s29_s30, 3 }
   0xb   : > { %p859_p7 = scmp.ne.s32.totalorder %s1283_s2, %s858_s10  ;;  %p865_p11 = scmp.lt.u32.totalorder %s858_s10, %s1283_s2 }
   0xc   : > { %s1292_s28 = scalar_select %p1093_p3, 1, 0 }
   0xd   : > { %p798_p4 = pneg %p1093_p3 }
   0xe   : > { %s1294_s7 = scalar_select %p1106_p6, 1, 0 }
   0xf   : > { %p1101_p5 = pnand %p1089_p2, %p798_p4 }
  0x11   : > { %p1118_p8 = pneg %p1101_p5 }
  0x13   : > { %p861_p9 = pnand %p1118_p8, %p859_p7 }
  0x15   : > { %p862_p10 = pneg %p861_p9 }
  0x17   : > { %p867_p12 = pnand %p865_p11, %p862_p10 }
  0x19   : > { %870 = shalt.err (!%p867_p12)
}
  0x1a   : > { %s871_s16 = scalar_lea.vmem %s229_s25, 4096  ;;  %p879_p4 = scmp.lt.s32.totalorder %s229_s25, %s229_s25 }
  0x1b   : > { %p872_p13 = scmp.ne.s32.totalorder %s229_s25, %s871_s16  ;;  %p880_p2 = scmp.lt.s32.totalorder %s871_s16, %s871_s16 }
  0x1d   : > { %p874_p0 = pnand %p872_p13, %p1118_p8  ;;  %p881_p3 = por %p880_p2, %p879_p4 }
  0x1f   : > { %p875_p1 = pneg %p874_p0 }
  0x21   : > { %p882_p6 = pnand %p881_p3, %p875_p1 }
  0x23   : > { %885 = shalt.err (!%p882_p6)
}
  0x24   : > { %s1022_s17 = smov 128   ;;  %s1023_s18 = smov 8  }
  0x25   : > { %807 = dma.hbm_to_vmem [thread:$0]  (!%p1101_p5), %s1283_s2, 4096, %s229_s25, [#allocation9], %s1022_s17, %s1022_s17, %s1023_s18  }
  0x26   : > { %p1296_p7 = scmp.ne.s32.totalorder %s1294_s7, 0  ;;  %s886_s9 = scalar_lea.hbm %s1281_s0, 16 }
  0x27   : > { %p887_p2 = scmp.ne.s32.totalorder %s1281_s0, %s886_s9  ;;  %p893_p9 = scmp.lt.u32.totalorder %s886_s9, %s1281_s0 }
  0x28   : > { %s1303_s30 = smov (%p1296_p7, %s29_s30), 0 }
  0x29   : > { %p889_p3 = pnand %p887_p2, %p1118_p8 }
  0x2b   : > { %p890_p6 = pneg %p889_p3 }
  0x2d   : > { %p895_p10 = pnand %p893_p9, %p890_p6 }
  0x2f   : > { %898 = shalt.err (!%p895_p10)
}
  0x30   : > { %s1024_s25 = smov [#allocation3]   ;;  %s1025_s16 = smov [#allocation7]  }
  0x31   : > { %801 = dma.hbm_to_smem (!%p1101_p5), %s1281_s0, 16, %s1024_s25, [#allocation6]  }
  0x32   : > { %s218_s19 = sshll.u32 %s1025_s16, 4  ;;  %s1026_s20 = smov [#allocation10]   ;;  %s219_s19 = int_to_ptr.vmem [resolvable:$true] %s218_s19 }
  0x33   : > { %s244_s24 = sshll.u32 %s1026_s20, 4  ;;  %s899_s11 = scalar_lea.hbm %s1282_s1, 128  ;;  %s245_s24 = int_to_ptr.vmem [resolvable:$true] %s244_s24 }
  0x34   : > { %p900_p11 = scmp.ne.s32.totalorder %s1282_s1, %s899_s11  ;;  %p906_p0 = scmp.lt.u32.totalorder %s899_s11, %s1282_s1 }
  0x36   : > { %p902_p12 = pnand %p900_p11, %p1118_p8 }
  0x38   : > { %p903_p13 = pneg %p902_p12 }
  0x3a   : > { %p908_p1 = pnand %p906_p0, %p903_p13 }
  0x3c   : > { %911 = shalt.err (!%p908_p1)
}
  0x3d   : > { %s912_s25 = scalar_lea.vmem %s219_s19, 128  ;;  %p920_p3 = scmp.lt.s32.totalorder %s219_s19, %s219_s19 }
  0x3e   : > { %p913_p4 = scmp.ne.s32.totalorder %s219_s19, %s912_s25  ;;  %p921_p6 = scmp.lt.s32.totalorder %s912_s25, %s912_s25 }
  0x40   : > { %p915_p7 = pnand %p913_p4, %p1118_p8  ;;  %p922_p9 = por %p921_p6, %p920_p3 }
  0x42   : > { %p916_p2 = pneg %p915_p7 }
  0x44   : > { %p923_p10 = pnand %p922_p9, %p916_p2 }
  0x46   : > { %926 = shalt.err (!%p923_p10)
}
  0x47   : > { %804 = dma.hbm_to_vmem [thread:$0]  (!%p1101_p5), %s1282_s1, 128, %s219_s19, [#allocation4]  }
  0x48   : > { %s927_s10 = scalar_lea.hbm %s1285_s4, 2048 }
  0x49   : > { %p928_p11 = scmp.ne.s32.totalorder %s1285_s4, %s927_s10  ;;  %p934_p0 = scmp.lt.u32.totalorder %s927_s10, %s1285_s4 }
  0x4b   : > { %p930_p12 = pnand %p928_p11, %p1118_p8 }
  0x4d   : > { %p931_p13 = pneg %p930_p12 }
  0x4f   : > { %p936_p1 = pnand %p934_p0, %p931_p13 }
  0x51   : > { %939 = shalt.err (!%p936_p1)
}
  0x52   : > { %s940_s7 = scalar_lea.vmem %s245_s24, 2048  ;;  %p948_p3 = scmp.lt.s32.totalorder %s245_s24, %s245_s24 }
  0x53   : > { %p941_p4 = scmp.ne.s32.totalorder %s245_s24, %s940_s7  ;;  %p949_p6 = scmp.lt.s32.totalorder %s940_s7, %s940_s7 }
  0x55   : > { %p943_p7 = pnand %p941_p4, %p1118_p8  ;;  %p950_p9 = por %p949_p6, %p948_p3 }
  0x57   : > { %p944_p2 = pneg %p943_p7 }
  0x59   : > { %p951_p10 = pnand %p950_p9, %p944_p2 }
  0x5b   : > { %954 = shalt.err (!%p951_p10)
}
  0x5c   : > { %810 = dma.hbm_to_vmem [thread:$0]  (!%p1101_p5), %s1285_s4, 2048, %s245_s24, [#allocation9], %s1022_s17, %s1022_s17, %s1023_s18  }
  0x5d   : > { %p1297_p11 = scmp.ne.s32.totalorder %s1292_s28, 0 }
  0x5e   : > { %p1298_p8 = scmp.ne.s32.totalorder (!%p1297_p11), %s1291_s27, 0 }
  0x5f   : > { %263 = sbr.rel (%p1297_p11) target bundleno = 652 (0x28c), region = 44 }
  0x66   : > { %994 = dma.done.wait (%p1298_p8), [#allocation6], 16  }
  0x67   : > { %996 = vsyncadd (%p1298_p8), [#allocation6], 4294967280 }
  0x68   : > { %998 = dma.done.wait (%p1298_p8), [#allocation4], 128  }
  0x69   : > { %1000 = vsyncadd (%p1298_p8), [#allocation4], 4294967168 }
  0x6a   : > { %1002 = dma.done.wait (%p1298_p8), [#allocation9], 6144  }
  0x6b   : > { %1004 = vsyncadd (%p1298_p8), [#allocation9], 4294961152 }
  0x6c   : > { %281 = sfence }
  0x6d   : > { %p296_p5 = scmp.lt.s32.totalorder %s1011_s21, 1  ;;  %p616_p12 = scmp.ne.s32.totalorder %s1011_s21, 0 }
  0x6e   : > { %v302_v0 = vld [vmem:[#allocation7] sm:$0xff] (!%p616_p12) }
  0x6f   : > { %s1212_s28 = scalar_select %p296_p5, %s1011_s21, 1 }
  0x70   : > { %301 = sbr.rel (%p616_p12) target bundleno = 119 (0x77), region = 64  ;;  %303 = vst [vmem:[#allocation2] sm:$0xff] (!%p616_p12), %v302_v0 }
  0x77 PF: > { %p617_p13 = scmp.ge.s32.totalorder %s1011_s21, 2 }
  0x78   : > { %s618_s29 = sshll.u32 (!%p617_p13), %s1212_s28, 7  ;;  %v1027_v1 = vmov (!%p617_p13), 0.0|0.0   ;;  %vm1028_vm0 = vmmov (!%p617_p13), 0   ;;  %v1029_v2 = vmov (!%p617_p13), 0.0   ;;  %v308_v27 = vld [vmem:[#allocation2] sm:$0xff] (!%p617_p13)  ;;  %s405_s13 = sld [smem:[#allocation3 + %s1212_s28]] (!%p617_p13) }
  0x79   : > { %307 = sbr.rel (%p617_p13) target bundleno = 377 (0x179), region = 68  ;;  %730 = vmatprep.subr.bf16.mxu0 (!%p617_p13), %v1027_v1  ;;  %692 = vmatprep.mubr.msk.f32.mxu0 (!%p617_p13), %vm1028_vm0, %v1029_v2  ;;  %s1217_s27 = scalar_lea.vmem (!%p617_p13), [#allocation8], %s618_s29 }
  0x7a   : > { %v311_v3 = vld [vmem:[%s1217_s27] sm:$0xff] (!%p617_p13)  ;;  %v312_v4 = vld [vmem:[%s1217_s27 + $0x8] sm:$0xff] (!%p617_p13)  ;;  %v313_v5 = vld [vmem:[%s1217_s27 + $0x10] sm:$0xff] (!%p617_p13)  ;;  %s327_s24 = scalar_lea.vmem (!%p617_p13), %s1284_s3, %s1212_s28 }
  0x7b   : > { %v731_v6 = vpack.c.bf16 (!%p617_p13), %v312_v4, %v311_v3  ;;  %v314_v7 = vld [vmem:[%s1217_s27 + $0x18] sm:$0xff] (!%p617_p13)  ;;  %v315_v9 = vld [vmem:[%s1217_s27 + $0x20] sm:$0xff] (!%p617_p13)  ;;  %v316_v10 = vld [vmem:[%s1217_s27 + $0x28] sm:$0xff] (!%p617_p13) }
  0x7c   : > { %v734_v8 = vpack.c.bf16 (!%p617_p13), %v314_v7, %v313_v5  ;;  %v737_v11 = vpack.c.bf16 (!%p617_p13), %v316_v10, %v315_v9  ;;  %v317_v12 = vld [vmem:[%s1217_s27 + $0x30] sm:$0xff] (!%p617_p13)  ;;  %v318_v13 = vld [vmem:[%s1217_s27 + $0x38] sm:$0xff] (!%p617_p13)  ;;  %v319_v15 = vld [vmem:[%s1217_s27 + $0x40] sm:$0xff] (!%p617_p13) }
  0x7d   : > { %732 = vmatpush3.bf16.msra.mxu0 (!%p617_p13), %v731_v6  ;;  %v740_v14 = vpack.c.bf16 (!%p617_p13), %v318_v13, %v317_v12  ;;  %v320_v16 = vld [vmem:[%s1217_s27 + $0x48] sm:$0xff] (!%p617_p13)  ;;  %v321_v18 = vld [vmem:[%s1217_s27 + $0x50] sm:$0xff] (!%p617_p13)  ;;  %v322_v19 = vld [vmem:[%s1217_s27 + $0x58] sm:$0xff] (!%p617_p13) }
  0x7e   : > { %733 = vmatprep.subr.bf16.mxu0 (!%p617_p13), %v1027_v1  ;;  %v743_v17 = vpack.c.bf16 (!%p617_p13), %v320_v16, %v319_v15  ;;  %v746_v20 = vpack.c.bf16 (!%p617_p13), %v322_v19, %v321_v18  ;;  %v323_v21 = vld [vmem:[%s1217_s27 + $0x60] sm:$0xff] (!%p617_p13)  ;;  %v324_v22 = vld [vmem:[%s1217_s27 + $0x68] sm:$0xff] (!%p617_p13)  ;;  %v325_v24 = vld [vmem:[%s1217_s27 + $0x70] sm:$0xff] (!%p617_p13)  ;;  %v407_v32 = vstv (!%p617_p13), %s405_s13 }
  0x7f   : > { %v749_v23 = vpack.c.bf16 (!%p617_p13), %v324_v22, %v323_v21  ;;  %v326_v25 = vld [vmem:[%s1217_s27 + $0x78] sm:$0xff] (!%p617_p13)  ;;  %v619_v28 = vld [vmem:[%s327_s24] ss:$0 sm:$0xff] (!%p617_p13) }
  0x80   : > { %v752_v26 = vpack.c.bf16 %v326_v25, %v325_v24 }
  0x81   : > { %735 = vmatpush3.bf16.msra.mxu0 %v734_v8 }
  0x82   : > { %736 = vmatprep.subr.bf16.mxu0 %v1027_v1 }
  0x85   : > { %738 = vmatpush3.bf16.msra.mxu0 %v737_v11 }
  0x86   : > { %739 = vmatprep.subr.bf16.mxu0 %v1027_v1 }
  0x89   : > { %741 = vmatpush3.bf16.msra.mxu0 %v740_v14 }
  0x8a   : > { %742 = vmatprep.subr.bf16.mxu0 %v1027_v1 }
  0x8d   : > { %744 = vmatpush3.bf16.msra.mxu0 %v743_v17 }
  0x8e   : > { %745 = vmatprep.subr.bf16.mxu0 %v1027_v1 }
  0x91   : > { %747 = vmatpush3.bf16.msra.mxu0 %v746_v20 }
  0x92   : > { %748 = vmatprep.subr.bf16.mxu0 %v1027_v1 }
  0x95   : > { %750 = vmatpush3.bf16.msra.mxu0 %v749_v23 }
  0x96   : > { %751 = vmatprep.subr.bf16.mxu0 %v1027_v1 }
  0x99   : > { %753 = vmatpush3.bf16.msra.mxu0 %v752_v26 }
  0x9c   : > { %693 = vmatmul.mubr.f32.vlgmr.msra.gmra.mrb[0].mxu0 %v308_v27 }
 0x16f   : > { %v401_v29 = vpop.f32.mrb[0].mxu0 }
 0x170   : > { %v402_v30 = vadd.f32 %v619_v28, %v401_v29  ;;  %v694_v31 = vpop.f32.mrb[1].mxu0 }
 0x172   : > { %v406_v33 = vmax.f32 %v402_v30, 0.0 }
 0x174   : > { %v408_v34 = vmul.f32 %v407_v32, %v406_v33 }
 0x176   : > { %v409_v35 = vadd.f32 %v408_v34, %v308_v27 }
 0x178   : > { %410 = vst [vmem:[#allocation2] sm:$0xff] %v409_v35 }
 0x179 PF: > { %p620_p0 = scmp.ne.s32.totalorder %s1011_s21, 2 }
 0x17a   : > { %v416_v36 = vld [vmem:[#allocation10] sm:$0xff] (!%p620_p0)  ;;  %v417_v37 = vld [vmem:[#allocation10 + $0x8] sm:$0xff] (!%p620_p0)  ;;  %v418_v38 = vld [vmem:[#allocation10 + $0x10] sm:$0xff] (!%p620_p0)  ;;  %v1030_v39 = vmov (!%p620_p0), 0.0|0.0   ;;  %vm1031_vm1 = vmmov (!%p620_p0), 0   ;;  %v1032_v42 = vmov (!%p620_p0), 0.0  }
 0x17b   : > { %414 = sbr.rel (%p620_p0) target bundleno = 627 (0x273), region = 72  ;;  %754 = vmatprep.subr.bf16.mxu0 (!%p620_p0), %v1030_v39  ;;  %v755_v40 = vpack.c.bf16 (!%p620_p0), %v417_v37, %v416_v36  ;;  %v419_v41 = vld [vmem:[#allocation10 + $0x18] sm:$0xff] (!%p620_p0)  ;;  %727 = vmatprep.mubr.msk.f32.mxu0 (!%p620_p0), %vm1031_vm1, %v1032_v42  ;;  %v420_v44 = vld [vmem:[#allocation10 + $0x20] sm:$0xff] (!%p620_p0)  ;;  %v421_v45 = vld [vmem:[#allocation10 + $0x28] sm:$0xff] (!%p620_p0) }
 0x17c   : > { %v758_v43 = vpack.c.bf16 (!%p620_p0), %v419_v41, %v418_v38  ;;  %v761_v46 = vpack.c.bf16 (!%p620_p0), %v421_v45, %v420_v44  ;;  %v422_v47 = vld [vmem:[#allocation10 + $0x30] sm:$0xff] (!%p620_p0)  ;;  %v423_v48 = vld [vmem:[#allocation10 + $0x38] sm:$0xff] (!%p620_p0)  ;;  %v424_v50 = vld [vmem:[#allocation10 + $0x40] sm:$0xff] (!%p620_p0) }
 0x17d   : > { %756 = vmatpush3.bf16.msra.mxu0 (!%p620_p0), %v755_v40  ;;  %v764_v49 = vpack.c.bf16 (!%p620_p0), %v423_v48, %v422_v47  ;;  %v425_v51 = vld [vmem:[#allocation10 + $0x48] sm:$0xff] (!%p620_p0)  ;;  %v426_v53 = vld [vmem:[#allocation10 + $0x50] sm:$0xff] (!%p620_p0)  ;;  %v427_v54 = vld [vmem:[#allocation10 + $0x58] sm:$0xff] (!%p620_p0) }
 0x17e   : > { %757 = vmatprep.subr.bf16.mxu0 (!%p620_p0), %v1030_v39  ;;  %v767_v52 = vpack.c.bf16 (!%p620_p0), %v425_v51, %v424_v50  ;;  %v770_v55 = vpack.c.bf16 (!%p620_p0), %v427_v54, %v426_v53  ;;  %v428_v56 = vld [vmem:[#allocation10 + $0x60] sm:$0xff] (!%p620_p0)  ;;  %v429_v57 = vld [vmem:[#allocation10 + $0x68] sm:$0xff] (!%p620_p0)  ;;  %v430_v59 = vld [vmem:[#allocation10 + $0x70] sm:$0xff] (!%p620_p0) }
 0x17f   : > { %v773_v58 = vpack.c.bf16 (!%p620_p0), %v429_v57, %v428_v56  ;;  %v431_v60 = vld [vmem:[#allocation10 + $0x78] sm:$0xff] (!%p620_p0)  ;;  %v415_v62 = vld [vmem:[#allocation2] sm:$0xff] (!%p620_p0)  ;;  %v621_v63 = vld [vmem:[%s1286_s5] ss:$0 sm:$0xff] (!%p620_p0) }
 0x180   : > { %v776_v61 = vpack.c.bf16 (!%p620_p0), %v431_v60, %v430_v59 }
 0x181   : > { %759 = vmatpush3.bf16.msra.mxu0 (!%p620_p0), %v758_v43 }
 0x182   : > { %760 = vmatprep.subr.bf16.mxu0 %v1030_v39 }
 0x185   : > { %762 = vmatpush3.bf16.msra.mxu0 %v761_v46 }
 0x186   : > { %763 = vmatprep.subr.bf16.mxu0 %v1030_v39 }
 0x189   : > { %765 = vmatpush3.bf16.msra.mxu0 %v764_v49 }
 0x18a   : > { %766 = vmatprep.subr.bf16.mxu0 %v1030_v39 }
 0x18d   : > { %768 = vmatpush3.bf16.msra.mxu0 %v767_v52 }
 0x18e   : > { %769 = vmatprep.subr.bf16.mxu0 %v1030_v39 }
 0x191   : > { %771 = vmatpush3.bf16.msra.mxu0 %v770_v55 }
 0x192   : > { %772 = vmatprep.subr.bf16.mxu0 %v1030_v39 }
 0x195   : > { %774 = vmatpush3.bf16.msra.mxu0 %v773_v58 }
 0x196   : > { %775 = vmatprep.subr.bf16.mxu0 %v1030_v39 }
 0x199   : > { %777 = vmatpush3.bf16.msra.mxu0 %v776_v61 }
 0x19c   : > { %728 = vmatmul.mubr.f32.vlgmr.msra.gmra.mrb[0].mxu0 %v415_v62 }
 0x26f   : > { %v505_v0 = vpop.f32.mrb[0].mxu0 }
 0x270   : > { %v506_v1 = vadd.f32 %v621_v63, %v505_v0  ;;  %v729_v2 = vpop.f32.mrb[1].mxu0 }
 0x272   : > { %509 = vst [vmem:[#allocation11] sm:$0xff] %v506_v1 }
 0x273 PF: > { %p1246_p1 = scmp.eq.s32.totalorder %s605_s26, 2  ;;  %s1033_s20 = smov [#allocation11]  }
 0x274   : > { %s519_s8 = sshll.u32 %s1033_s20, 4  ;;  %s520_s8 = int_to_ptr.vmem [resolvable:$true] %s519_s8 }
 0x275   : > { %s955_s10 = scalar_lea.vmem %s520_s8, 128  ;;  %p962_p3 = scmp.lt.s32.totalorder %s520_s8, %s520_s8 }
 0x276   : > { %p956_p4 = scmp.ne.s32.totalorder %s520_s8, %s955_s10  ;;  %p963_p6 = scmp.lt.s32.totalorder %s955_s10, %s955_s10 }
 0x278   : > { %p957_p7 = pnand %p956_p4, %p1246_p1  ;;  %p964_p9 = por %p963_p6, %p962_p3 }
 0x27a   : > { %p958_p2 = pneg %p957_p7 }
 0x27c   : > { %p965_p10 = pnand %p964_p9, %p958_p2 }
 0x27e   : > { %968 = shalt.err (!%p965_p10)
}
 0x27f   : > { %s969_s26 = scalar_lea.hbm %s1287_s6, 128 }
 0x280   : > { %p970_p11 = scmp.ne.s32.totalorder %s1287_s6, %s969_s26  ;;  %p975_p12 = scmp.lt.u32.totalorder %s969_s26, %s1287_s6 }
 0x282   : > { %p971_p8 = pnand %p970_p11, %p1246_p1 }
 0x284   : > { %p972_p5 = pneg %p971_p8 }
 0x286   : > { %p977_p13 = pnand %p975_p12, %p972_p5 }
 0x288   : > { %980 = shalt.err (!%p977_p13)
}
 0x289   : > { %795 = dma.vmem_to_hbm [thread:$0]  (%p1246_p1), %s520_s8, 128, %s1287_s6, [#allocation5]  }
 0x28a   : > { %1006 = dma.done.wait (%p1246_p1), [#allocation5], 128  }
 0x28b   : > { %1008 = vsyncadd (%p1246_p1), [#allocation5], 4294967168 }
 0x28c PF: > { %s20_s23 = sadd.s32 1, %s1019_s23   ;;  %s1300_s21 = smov %s1015_s22 }
 0x28d   : > { %p17_p0 = scmp.ge.s32.totalorder %s20_s23, 5   ;;  %s1301_s22 = smov %s1303_s30 }
 0x28f   :  { %19 = sbr.rel (!%p17_p0) target bundleno = 5 (0x5), region = 102 }
 0x296   :  { %532 = vsyncpa [#allocation4], 1 }
 0x297   :  { %534 = vsyncpa [#allocation4 + $0x1], 1 }
 0x298   :  { %535 = vsyncpa [#allocation9], 1 }
 0x299   :  { %536 = vsyncpa [#allocation5], 1 }
 0x29a   :  { %538 = vsyncpa [#allocation5 + $0x1], 1 }
 0x29b   :  { %539 = vsyncpa [#allocation6], 1 }
 0x29c   :  { %541 = vsyncpa [#allocation6 + $0x1], 1 }

</bundles_post_ra>
